<compile_context>
chip_gen: v5e
topology: v5e:2x2
jax: 0.10.0
libtpu: 0.0.40
codegen_flags: <defaults>
</compile_context>

<pallas_src>
import functools
import jax
import jax.numpy as jnp
from jax.experimental import pallas as pl
from jax.experimental.pallas import tpu as pltpu

_F32 = jnp.float32
_BF16 = jnp.bfloat16
_MiB = 1024 * 1024


def _layer_norm(v, w, b, eps=1e-5):
    mu = jnp.mean(v, axis=-1, keepdims=True)
    var = jnp.mean((v - mu) ** 2, axis=-1, keepdims=True)
    return (v - mu) * jax.lax.rsqrt(var + eps) * w + b


def _gelu_exact(x):
    # PyTorch nn.GELU default = exact erf-based GELU.
    return 0.5 * x * (1.0 + jax.lax.erf(x * 0.7071067811865476))


def _vmem_limit(est_bytes):
    # Generous headroom, clamped so the request is valid on every chip
    # (v7x has only 64 MiB physical VMEM per TensorCore).
    return int(max(32 * _MiB, min(64 * _MiB, 2 * int(est_bytes))))


# -----------------------------------------------------------------------------
# Pass 1: x1 = x + Attention(LN1(x)) * (1/skip_lam).  One grid step per batch
# element (softmax needs the whole sequence).  Static per-head loop of 2-D
# MXU matmuls; per-head proj contributions accumulated in f32.
# -----------------------------------------------------------------------------
def _attn_kernel(x_ref, ln1_w_ref, ln1_b_ref, qkv_w_ref, proj_w_ref, proj_b_ref,
                 x1_ref, *, num_heads, head_dim, inv_skip_lam):
    x = x_ref[0]                                   # (N, C) f32
    n, c = x.shape
    d = num_heads * head_dim
    scale = head_dim ** -0.5

    xn = _layer_norm(x, ln1_w_ref[0], ln1_b_ref[0])                    # f32
    qkv = jnp.dot(xn.astype(_BF16), qkv_w_ref[...],
                  preferred_element_type=_F32)                         # (N, 3d) f32

    proj_acc = jnp.zeros((n, c), _F32)
    for h in range(num_heads):
        lo, hi = h * head_dim, (h + 1) * head_dim
        q_h = (qkv[:, lo:hi] * scale).astype(_BF16)                    # (N, hd)
        k_h = qkv[:, d + lo:d + hi].astype(_BF16)                      # (N, hd)
        v_h = qkv[:, 2 * d + lo:2 * d + hi].astype(_BF16)              # (N, hd)

        # scores: contract on head_dim of both operands -> no k transpose.
        s = jax.lax.dot_general(q_h, k_h, (((1,), (1,)), ((), ())),
                                preferred_element_type=_F32)           # (N, N)
        s = s - jnp.max(s, axis=-1, keepdims=True)
        p = jnp.exp(s)
        p = p * pl.reciprocal(jnp.sum(p, axis=-1, keepdims=True), approx=True)

        av = jnp.dot(p.astype(_BF16), v_h, preferred_element_type=_F32)  # (N, hd)
        proj_acc += jnp.dot(av.astype(_BF16), proj_w_ref[lo:hi, :],
                            preferred_element_type=_F32)                 # (N, C)

    x1 = x + (proj_acc + proj_b_ref[0]) * inv_skip_lam
    x1_ref[0] = x1.astype(x1_ref.dtype)


# -----------------------------------------------------------------------------
# Pass 2: out = x1 + MLP(LN2(x1)) * (1/skip_lam).  Token-tiled, fully parallel.
# -----------------------------------------------------------------------------
def _mlp_kernel(x1_ref, ln2_w_ref, ln2_b_ref, fc1_w_ref, fc1_b_ref,
                fc2_w_ref, fc2_b_ref, o_ref, *, inv_skip_lam):
    x1 = x1_ref[0]                                                     # (TN, C) f32
    xn = _layer_norm(x1, ln2_w_ref[0], ln2_b_ref[0])
    h = jnp.dot(xn.astype(_BF16), fc1_w_ref[...],
                preferred_element_type=_F32) + fc1_b_ref[0]
    h = _gelu_exact(h)
    y = jnp.dot(h.astype(_BF16), fc2_w_ref[...],
                preferred_element_type=_F32) + fc2_b_ref[0]
    o_ref[0] = (x1 + y * inv_skip_lam).astype(o_ref.dtype)


def block_forward(x, params, *, num_heads, head_dim, skip_lam=1.0):
    """x: (B, N, C) float32.  params: dict from init_params (f32 masters)."""
    B, N, C = x.shape
    d = num_heads * head_dim
    hidden = params['fc1_w'].shape[1]
    inv_skip_lam = float(1.0 / skip_lam)

    # bf16 matmul weights (halves HBM traffic / VMEM residency); LN + biases f32.
    qkv_w = params['qkv_w'].astype(_BF16)
    proj_w = params['proj_w'].astype(_BF16)
    fc1_w = params['fc1_w'].astype(_BF16)
    fc2_w = params['fc2_w'].astype(_BF16)

    # Whole-array, single-copy VMEM residency for parameters (no double buffer).
    vmem_spec = pl.BlockSpec(memory_space=pltpu.MemorySpace.VMEM)

    # ---------------- attention pass ----------------
    attn_kernel = functools.partial(_attn_kernel, num_heads=num_heads,
                                    head_dim=head_dim, inv_skip_lam=inv_skip_lam)
    attn_flops = B * (2 * N * C * 3 * d + 4 * num_heads * N * N * head_dim
                      + 2 * N * d * C)
    attn_bytes = 2 * B * N * C * 4 + (C * 3 * d + d * C) * 2 + 4 * C * 4
    attn_vmem = (4 * N * C * 4                       # in/out blocks, double-buffered
                 + (C * 3 * d + d * C) * 2 + 6 * C * 4
                 + N * 3 * d * 4 + 4 * N * N * 4 + 2 * N * C * 4)

    x1 = pl.pallas_call(
        attn_kernel,
        out_shape=jax.ShapeDtypeStruct((B, N, C), x.dtype),
        grid_spec=pltpu.PrefetchScalarGridSpec(
            num_scalar_prefetch=0,
            grid=(B,),
            in_specs=[
                pl.BlockSpec((1, N, C), lambda b: (b, 0, 0)),   # x
                vmem_spec, vmem_spec,                           # ln1 w, b
                vmem_spec,                                      # qkv_w  (C, 3d) bf16
                vmem_spec, vmem_spec,                           # proj w (d, C) bf16, b
            ],
            out_specs=pl.BlockSpec((1, N, C), lambda b: (b, 0, 0)),
        ),
        compiler_params=pltpu.CompilerParams(
            dimension_semantics=("parallel",),
            vmem_limit_bytes=_vmem_limit(attn_vmem)),
        cost_estimate=pl.CostEstimate(flops=int(attn_flops),
                                      transcendentals=int(B * num_heads * N * N),
                                      bytes_accessed=int(attn_bytes)),
    )(x, params['ln1_w'], params['ln1_b'], qkv_w, proj_w, params['proj_b'])

    # ---------------- MLP pass (token-tiled) ----------------
    tn = N if N <= 128 else 128
    mlp_kernel = functools.partial(_mlp_kernel, inv_skip_lam=inv_skip_lam)
    mlp_flops = B * 4 * N * C * hidden
    mlp_bytes = 2 * B * N * C * 4 + 2 * C * hidden * 2 + (hidden + 3 * C) * 4
    mlp_vmem = (4 * tn * C * 4
                + 2 * C * hidden * 2 + (hidden + 3 * C) * 4
                + 2 * tn * hidden * 4 + 2 * tn * C * 4)

    out = pl.pallas_call(
        mlp_kernel,
        out_shape=jax.ShapeDtypeStruct((B, N, C), x.dtype),
        grid_spec=pltpu.PrefetchScalarGridSpec(
            num_scalar_prefetch=0,
            grid=(B, pl.cdiv(N, tn)),
            in_specs=[
                pl.BlockSpec((1, tn, C), lambda b, t: (b, t, 0)),   # x1 tile
                vmem_spec, vmem_spec,                               # ln2 w, b
                vmem_spec, vmem_spec,                               # fc1 w (C, H) bf16, b
                vmem_spec, vmem_spec,                               # fc2 w (H, C) bf16, b
            ],
            out_specs=pl.BlockSpec((1, tn, C), lambda b, t: (b, t, 0)),
        ),
        compiler_params=pltpu.CompilerParams(
            dimension_semantics=("parallel", "parallel"),
            vmem_limit_bytes=_vmem_limit(mlp_vmem)),
        cost_estimate=pl.CostEstimate(flops=int(mlp_flops),
                                      transcendentals=int(B * N * hidden),
                                      bytes_accessed=int(mlp_bytes)),
    )(x1, params['ln2_w'], params['ln2_b'], fc1_w, params['fc1_b'],
      fc2_w, params['fc2_b'])
    return out


def init_params(key, dim, num_heads, head_dim, mlp_ratio=4.0):
    hidden = int(dim * mlp_ratio)
    d = num_heads * head_dim
    ks = jax.random.split(key, 6)
    s = 0.05
    return dict(
        ln1_w=jnp.ones((1, dim), _F32),
        ln1_b=jnp.zeros((1, dim), _F32),
        qkv_w=s * jax.random.normal(ks[0], (dim, 3 * d), _F32),   # (in, out), no qkv bias
        proj_w=s * jax.random.normal(ks[1], (d, dim), _F32),
        proj_b=s * jax.random.normal(ks[2], (1, dim), _F32),
        ln2_w=jnp.ones((1, dim), _F32),
        ln2_b=jnp.zeros((1, dim), _F32),
        fc1_w=s * jax.random.normal(ks[3], (dim, hidden), _F32),
        fc1_b=jnp.zeros((1, hidden), _F32),
        fc2_w=s * jax.random.normal(ks[4], (hidden, dim), _F32),
        fc2_b=jnp.zeros((1, dim), _F32),
    )


def block_reference(x, p, *, num_heads, head_dim, skip_lam=1.0):
    """Pure-JAX f32 reference mirroring the PyTorch forward (for verification)."""
    B, N, C = x.shape
    d = num_heads * head_dim
    scale = head_dim ** -0.5

    def ln(v, w, b):
        mu = v.mean(-1, keepdims=True)
        var = ((v - mu) ** 2).mean(-1, keepdims=True)
        return (v - mu) / jnp.sqrt(var + 1e-5) * w[0] + b[0]

    xn = ln(x, p['ln1_w'], p['ln1_b'])
    qkv = xn @ p['qkv_w']
    qkv = qkv.reshape(B, N, 3, num_heads, head_dim).transpose(2, 0, 3, 1, 4)
    q, k, v = qkv[0], qkv[1], qkv[2]
    attn = jnp.einsum('bhnd,bhmd->bhnm', q * scale, k)
    attn = jax.nn.softmax(attn, axis=-1)
    av = jnp.einsum('bhnm,bhmd->bhnd', attn, v).transpose(0, 2, 1, 3).reshape(B, N, d)
    x1 = x + (av @ p['proj_w'] + p['proj_b'][0]) / skip_lam
    x2n = ln(x1, p['ln2_w'], p['ln2_b'])
    h = jax.nn.gelu(x2n @ p['fc1_w'] + p['fc1_b'][0], approximate=False)
    y = h @ p['fc2_w'] + p['fc2_b'][0]
    return x1 + y / skip_lam


if __name__ == "__main__":
    B, N, dim = 2, 16, 32
    num_heads, head_dim = 4, 8          # head_dim = dim // num_heads
    mlp_ratio = 4.0

    key = jax.random.PRNGKey(0)
    kx, kp = jax.random.split(key)
    x = jax.random.normal(kx, (B, N, dim), _F32)
    params = init_params(kp, dim, num_heads, head_dim, mlp_ratio)

    out = block_forward(x, params, num_heads=num_heads, head_dim=head_dim)
    out = jax.block_until_ready(out)

    ref = block_reference(x, params, num_heads=num_heads, head_dim=head_dim)
    assert out.shape == (B, N, dim)
    # Tolerance loosened for bf16 matmul operands + approx reciprocal.
    assert jnp.allclose(out, ref, atol=2e-2, rtol=2e-2), \
        f"max abs diff {jnp.max(jnp.abs(out - ref))}"

    print("KERNEL_OK")
</pallas_src>

<mosaic_0001>
module attributes {stable_mosaic.version = 11 : i64} {
  func.func @_attn_kernel(%arg0: i32, %arg1: memref<1x16x32xf32, #tpu.memory_space<vmem>>, %arg2: memref<1x32xf32, #tpu.memory_space<vmem>>, %arg3: memref<1x32xf32, #tpu.memory_space<vmem>>, %arg4: memref<32x96xbf16, #tpu.memory_space<vmem>>, %arg5: memref<32x32xbf16, #tpu.memory_space<vmem>>, %arg6: memref<1x32xf32, #tpu.memory_space<vmem>>, %arg7: memref<1x16x32xf32, #tpu.memory_space<vmem>>) attributes {dimension_semantics = [#tpu.dimension_semantics<parallel>], iteration_bounds = array<i64: 2>, scalar_prefetch = 0 : i64, scratch_operands = 0 : i64, tpu.core_type = #tpu.core_type<tc>, window_params = [{transform_indices = @transform_0, window_bounds = array<i64: 1, 16, 32>}, {pipeline_mode = #tpu.pipeline_mode<synchronous>, transform_indices = @transform_1, window_bounds = array<i64: 1, 32>}, {pipeline_mode = #tpu.pipeline_mode<synchronous>, transform_indices = @transform_2, window_bounds = array<i64: 1, 32>}, {pipeline_mode = #tpu.pipeline_mode<synchronous>, transform_indices = @transform_3, window_bounds = array<i64: 32, 96>}, {pipeline_mode = #tpu.pipeline_mode<synchronous>, transform_indices = @transform_4, window_bounds = array<i64: 32, 32>}, {pipeline_mode = #tpu.pipeline_mode<synchronous>, transform_indices = @transform_5, window_bounds = array<i64: 1, 32>}, {transform_indices = @transform_6, window_bounds = array<i64: 1, 16, 32>}]} {
    %c0 = arith.constant 0 : index
    %c0_0 = arith.constant 0 : index
    %c0_1 = arith.constant 0 : index
    %0 = vector.load %arg1[%c0, %c0_0, %c0_1] : memref<1x16x32xf32, #tpu.memory_space<vmem>>, vector<1x16x32xf32>
    %1 = vector.shape_cast %0 : vector<1x16x32xf32> to vector<16x32xf32>
    %c0_2 = arith.constant 0 : index
    %c0_3 = arith.constant 0 : index
    %2 = vector.load %arg2[%c0_2, %c0_3] : memref<1x32xf32, #tpu.memory_space<vmem>>, vector<1x32xf32>
    %3 = vector.shape_cast %2 : vector<1x32xf32> to vector<32xf32>
    %c0_4 = arith.constant 0 : index
    %c0_5 = arith.constant 0 : index
    %4 = vector.load %arg3[%c0_4, %c0_5] : memref<1x32xf32, #tpu.memory_space<vmem>>, vector<1x32xf32>
    %5 = vector.shape_cast %4 : vector<1x32xf32> to vector<32xf32>
    %cst = arith.constant dense<0.000000e+00> : vector<16xf32>
    %6 = vector.multi_reduction <add>, %1, %cst [1] : vector<16x32xf32> to vector<16xf32>
    %7 = vector.shape_cast %6 : vector<16xf32> to vector<16x1xf32>
    %cst_6 = arith.constant 3.200000e+01 : f32
    %8 = vector.broadcast %cst_6 : f32 to vector<16x1xf32>
    %9 = arith.divf %7, %8 : vector<16x1xf32>
    %10 = vector.broadcast %9 : vector<16x1xf32> to vector<16x32xf32>
    %11 = arith.subf %1, %10 : vector<16x32xf32>
    %12 = arith.mulf %11, %11 : vector<16x32xf32>
    %cst_7 = arith.constant dense<0.000000e+00> : vector<16xf32>
    %13 = vector.multi_reduction <add>, %12, %cst_7 [1] : vector<16x32xf32> to vector<16xf32>
    %14 = vector.shape_cast %13 : vector<16xf32> to vector<16x1xf32>
    %cst_8 = arith.constant 3.200000e+01 : f32
    %15 = vector.broadcast %cst_8 : f32 to vector<16x1xf32>
    %16 = arith.divf %14, %15 : vector<16x1xf32>
    %17 = vector.broadcast %9 : vector<16x1xf32> to vector<16x32xf32>
    %18 = arith.subf %1, %17 : vector<16x32xf32>
    %cst_9 = arith.constant 9.99999974E-6 : f32
    %19 = vector.broadcast %cst_9 : f32 to vector<16x1xf32>
    %20 = arith.addf %16, %19 : vector<16x1xf32>
    %21 = math.rsqrt %20 : vector<16x1xf32>
    %22 = vector.broadcast %21 : vector<16x1xf32> to vector<16x32xf32>
    %23 = arith.mulf %18, %22 : vector<16x32xf32>
    %24 = vector.shape_cast %3 : vector<32xf32> to vector<1x32xf32>
    %25 = vector.broadcast %24 : vector<1x32xf32> to vector<16x32xf32>
    %26 = arith.mulf %23, %25 : vector<16x32xf32>
    %27 = vector.shape_cast %5 : vector<32xf32> to vector<1x32xf32>
    %28 = vector.broadcast %27 : vector<1x32xf32> to vector<16x32xf32>
    %29 = arith.addf %26, %28 : vector<16x32xf32>
    %30 = arith.truncf %29 : vector<16x32xf32> to vector<16x32xbf16>
    %c0_10 = arith.constant 0 : index
    %c0_11 = arith.constant 0 : index
    %31 = vector.load %arg4[%c0_10, %c0_11] : memref<32x96xbf16, #tpu.memory_space<vmem>>, vector<32x96xbf16>
    %cst_12 = arith.constant dense<0.000000e+00> : vector<16x96xf32>
    %32 = tpu.matmul %30, %31, %cst_12 {dimension_numbers = #tpu.dot_dimension_numbers<[1], [0], [0], [1], [0, 0, 1, 1], [], []>} : vector<16x32xbf16>, vector<32x96xbf16>, vector<16x96xf32> -> vector<16x96xf32>
    %cst_13 = arith.constant 0.000000e+00 : f32
    %33 = vector.broadcast %cst_13 : f32 to vector<16x32xf32>
    %34 = vector.extract_strided_slice %32 {offsets = [0, 0], sizes = [16, 8], strides = [1, 1]} : vector<16x96xf32> to vector<16x8xf32>
    %cst_14 = arith.constant 0.353553385 : f32
    %35 = vector.broadcast %cst_14 : f32 to vector<16x8xf32>
    %36 = arith.mulf %34, %35 : vector<16x8xf32>
    %37 = arith.truncf %36 : vector<16x8xf32> to vector<16x8xbf16>
    %38 = vector.extract_strided_slice %32 {offsets = [0, 32], sizes = [16, 8], strides = [1, 1]} : vector<16x96xf32> to vector<16x8xf32>
    %39 = arith.truncf %38 : vector<16x8xf32> to vector<16x8xbf16>
    %40 = vector.extract_strided_slice %32 {offsets = [0, 64], sizes = [16, 8], strides = [1, 1]} : vector<16x96xf32> to vector<16x8xf32>
    %41 = arith.truncf %40 : vector<16x8xf32> to vector<16x8xbf16>
    %cst_15 = arith.constant dense<0.000000e+00> : vector<16x16xf32>
    %42 = tpu.matmul %37, %39, %cst_15 {dimension_numbers = #tpu.dot_dimension_numbers<[1], [1], [0], [0], [0, 0, 1, 0], [], []>} : vector<16x8xbf16>, vector<16x8xbf16>, vector<16x16xf32> -> vector<16x16xf32>
    %cst_16 = arith.constant dense<0xFF800000> : vector<16xf32>
    %43 = vector.multi_reduction <maximumf>, %42, %cst_16 [1] : vector<16x16xf32> to vector<16xf32>
    %44 = vector.shape_cast %43 : vector<16xf32> to vector<16x1xf32>
    %45 = vector.broadcast %44 : vector<16x1xf32> to vector<16x16xf32>
    %46 = arith.subf %42, %45 : vector<16x16xf32>
    %47 = math.exp %46 : vector<16x16xf32>
    %cst_17 = arith.constant dense<0.000000e+00> : vector<16xf32>
    %48 = vector.multi_reduction <add>, %47, %cst_17 [1] : vector<16x16xf32> to vector<16xf32>
    %49 = vector.shape_cast %48 : vector<16xf32> to vector<16x1xf32>
    %50 = tpu.reciprocal %49 {approx = true} : vector<16x1xf32> -> vector<16x1xf32>
    %51 = vector.broadcast %50 : vector<16x1xf32> to vector<16x16xf32>
    %52 = arith.mulf %47, %51 : vector<16x16xf32>
    %53 = arith.truncf %52 : vector<16x16xf32> to vector<16x16xbf16>
    %cst_18 = arith.constant dense<0.000000e+00> : vector<16x8xf32>
    %54 = tpu.matmul %53, %41, %cst_18 {dimension_numbers = #tpu.dot_dimension_numbers<[1], [0], [0], [1], [0, 0, 1, 1], [], []>} : vector<16x16xbf16>, vector<16x8xbf16>, vector<16x8xf32> -> vector<16x8xf32>
    %55 = arith.truncf %54 : vector<16x8xf32> to vector<16x8xbf16>
    %c0_19 = arith.constant 0 : index
    %c0_20 = arith.constant 0 : index
    %56 = vector.load %arg5[%c0_19, %c0_20] : memref<32x32xbf16, #tpu.memory_space<vmem>>, vector<8x32xbf16>
    %cst_21 = arith.constant dense<0.000000e+00> : vector<16x32xf32>
    %57 = tpu.matmul %55, %56, %cst_21 {dimension_numbers = #tpu.dot_dimension_numbers<[1], [0], [0], [1], [0, 0, 1, 1], [], []>} : vector<16x8xbf16>, vector<8x32xbf16>, vector<16x32xf32> -> vector<16x32xf32>
    %58 = arith.addf %33, %57 : vector<16x32xf32>
    %59 = vector.extract_strided_slice %32 {offsets = [0, 8], sizes = [16, 8], strides = [1, 1]} : vector<16x96xf32> to vector<16x8xf32>
    %cst_22 = arith.constant 0.353553385 : f32
    %60 = vector.broadcast %cst_22 : f32 to vector<16x8xf32>
    %61 = arith.mulf %59, %60 : vector<16x8xf32>
    %62 = arith.truncf %61 : vector<16x8xf32> to vector<16x8xbf16>
    %63 = vector.extract_strided_slice %32 {offsets = [0, 40], sizes = [16, 8], strides = [1, 1]} : vector<16x96xf32> to vector<16x8xf32>
    %64 = arith.truncf %63 : vector<16x8xf32> to vector<16x8xbf16>
    %65 = vector.extract_strided_slice %32 {offsets = [0, 72], sizes = [16, 8], strides = [1, 1]} : vector<16x96xf32> to vector<16x8xf32>
    %66 = arith.truncf %65 : vector<16x8xf32> to vector<16x8xbf16>
    %cst_23 = arith.constant dense<0.000000e+00> : vector<16x16xf32>
    %67 = tpu.matmul %62, %64, %cst_23 {dimension_numbers = #tpu.dot_dimension_numbers<[1], [1], [0], [0], [0, 0, 1, 0], [], []>} : vector<16x8xbf16>, vector<16x8xbf16>, vector<16x16xf32> -> vector<16x16xf32>
    %cst_24 = arith.constant dense<0xFF800000> : vector<16xf32>
    %68 = vector.multi_reduction <maximumf>, %67, %cst_24 [1] : vector<16x16xf32> to vector<16xf32>
    %69 = vector.shape_cast %68 : vector<16xf32> to vector<16x1xf32>
    %70 = vector.broadcast %69 : vector<16x1xf32> to vector<16x16xf32>
    %71 = arith.subf %67, %70 : vector<16x16xf32>
    %72 = math.exp %71 : vector<16x16xf32>
    %cst_25 = arith.constant dense<0.000000e+00> : vector<16xf32>
    %73 = vector.multi_reduction <add>, %72, %cst_25 [1] : vector<16x16xf32> to vector<16xf32>
    %74 = vector.shape_cast %73 : vector<16xf32> to vector<16x1xf32>
    %75 = tpu.reciprocal %74 {approx = true} : vector<16x1xf32> -> vector<16x1xf32>
    %76 = vector.broadcast %75 : vector<16x1xf32> to vector<16x16xf32>
    %77 = arith.mulf %72, %76 : vector<16x16xf32>
    %78 = arith.truncf %77 : vector<16x16xf32> to vector<16x16xbf16>
    %cst_26 = arith.constant dense<0.000000e+00> : vector<16x8xf32>
    %79 = tpu.matmul %78, %66, %cst_26 {dimension_numbers = #tpu.dot_dimension_numbers<[1], [0], [0], [1], [0, 0, 1, 1], [], []>} : vector<16x16xbf16>, vector<16x8xbf16>, vector<16x8xf32> -> vector<16x8xf32>
    %80 = arith.truncf %79 : vector<16x8xf32> to vector<16x8xbf16>
    %c8 = arith.constant 8 : index
    %c0_27 = arith.constant 0 : index
    %81 = vector.load %arg5[%c8, %c0_27] : memref<32x32xbf16, #tpu.memory_space<vmem>>, vector<8x32xbf16>
    %cst_28 = arith.constant dense<0.000000e+00> : vector<16x32xf32>
    %82 = tpu.matmul %80, %81, %cst_28 {dimension_numbers = #tpu.dot_dimension_numbers<[1], [0], [0], [1], [0, 0, 1, 1], [], []>} : vector<16x8xbf16>, vector<8x32xbf16>, vector<16x32xf32> -> vector<16x32xf32>
    %83 = arith.addf %58, %82 : vector<16x32xf32>
    %84 = vector.extract_strided_slice %32 {offsets = [0, 16], sizes = [16, 8], strides = [1, 1]} : vector<16x96xf32> to vector<16x8xf32>
    %cst_29 = arith.constant 0.353553385 : f32
    %85 = vector.broadcast %cst_29 : f32 to vector<16x8xf32>
    %86 = arith.mulf %84, %85 : vector<16x8xf32>
    %87 = arith.truncf %86 : vector<16x8xf32> to vector<16x8xbf16>
    %88 = vector.extract_strided_slice %32 {offsets = [0, 48], sizes = [16, 8], strides = [1, 1]} : vector<16x96xf32> to vector<16x8xf32>
    %89 = arith.truncf %88 : vector<16x8xf32> to vector<16x8xbf16>
    %90 = vector.extract_strided_slice %32 {offsets = [0, 80], sizes = [16, 8], strides = [1, 1]} : vector<16x96xf32> to vector<16x8xf32>
    %91 = arith.truncf %90 : vector<16x8xf32> to vector<16x8xbf16>
    %cst_30 = arith.constant dense<0.000000e+00> : vector<16x16xf32>
    %92 = tpu.matmul %87, %89, %cst_30 {dimension_numbers = #tpu.dot_dimension_numbers<[1], [1], [0], [0], [0, 0, 1, 0], [], []>} : vector<16x8xbf16>, vector<16x8xbf16>, vector<16x16xf32> -> vector<16x16xf32>
    %cst_31 = arith.constant dense<0xFF800000> : vector<16xf32>
    %93 = vector.multi_reduction <maximumf>, %92, %cst_31 [1] : vector<16x16xf32> to vector<16xf32>
    %94 = vector.shape_cast %93 : vector<16xf32> to vector<16x1xf32>
    %95 = vector.broadcast %94 : vector<16x1xf32> to vector<16x16xf32>
    %96 = arith.subf %92, %95 : vector<16x16xf32>
    %97 = math.exp %96 : vector<16x16xf32>
    %cst_32 = arith.constant dense<0.000000e+00> : vector<16xf32>
    %98 = vector.multi_reduction <add>, %97, %cst_32 [1] : vector<16x16xf32> to vector<16xf32>
    %99 = vector.shape_cast %98 : vector<16xf32> to vector<16x1xf32>
    %100 = tpu.reciprocal %99 {approx = true} : vector<16x1xf32> -> vector<16x1xf32>
    %101 = vector.broadcast %100 : vector<16x1xf32> to vector<16x16xf32>
    %102 = arith.mulf %97, %101 : vector<16x16xf32>
    %103 = arith.truncf %102 : vector<16x16xf32> to vector<16x16xbf16>
    %cst_33 = arith.constant dense<0.000000e+00> : vector<16x8xf32>
    %104 = tpu.matmul %103, %91, %cst_33 {dimension_numbers = #tpu.dot_dimension_numbers<[1], [0], [0], [1], [0, 0, 1, 1], [], []>} : vector<16x16xbf16>, vector<16x8xbf16>, vector<16x8xf32> -> vector<16x8xf32>
    %105 = arith.truncf %104 : vector<16x8xf32> to vector<16x8xbf16>
    %c16 = arith.constant 16 : index
    %c0_34 = arith.constant 0 : index
    %106 = vector.load %arg5[%c16, %c0_34] : memref<32x32xbf16, #tpu.memory_space<vmem>>, vector<8x32xbf16>
    %cst_35 = arith.constant dense<0.000000e+00> : vector<16x32xf32>
    %107 = tpu.matmul %105, %106, %cst_35 {dimension_numbers = #tpu.dot_dimension_numbers<[1], [0], [0], [1], [0, 0, 1, 1], [], []>} : vector<16x8xbf16>, vector<8x32xbf16>, vector<16x32xf32> -> vector<16x32xf32>
    %108 = arith.addf %83, %107 : vector<16x32xf32>
    %109 = vector.extract_strided_slice %32 {offsets = [0, 24], sizes = [16, 8], strides = [1, 1]} : vector<16x96xf32> to vector<16x8xf32>
    %cst_36 = arith.constant 0.353553385 : f32
    %110 = vector.broadcast %cst_36 : f32 to vector<16x8xf32>
    %111 = arith.mulf %109, %110 : vector<16x8xf32>
    %112 = arith.truncf %111 : vector<16x8xf32> to vector<16x8xbf16>
    %113 = vector.extract_strided_slice %32 {offsets = [0, 56], sizes = [16, 8], strides = [1, 1]} : vector<16x96xf32> to vector<16x8xf32>
    %114 = arith.truncf %113 : vector<16x8xf32> to vector<16x8xbf16>
    %115 = vector.extract_strided_slice %32 {offsets = [0, 88], sizes = [16, 8], strides = [1, 1]} : vector<16x96xf32> to vector<16x8xf32>
    %116 = arith.truncf %115 : vector<16x8xf32> to vector<16x8xbf16>
    %cst_37 = arith.constant dense<0.000000e+00> : vector<16x16xf32>
    %117 = tpu.matmul %112, %114, %cst_37 {dimension_numbers = #tpu.dot_dimension_numbers<[1], [1], [0], [0], [0, 0, 1, 0], [], []>} : vector<16x8xbf16>, vector<16x8xbf16>, vector<16x16xf32> -> vector<16x16xf32>
    %cst_38 = arith.constant dense<0xFF800000> : vector<16xf32>
    %118 = vector.multi_reduction <maximumf>, %117, %cst_38 [1] : vector<16x16xf32> to vector<16xf32>
    %119 = vector.shape_cast %118 : vector<16xf32> to vector<16x1xf32>
    %120 = vector.broadcast %119 : vector<16x1xf32> to vector<16x16xf32>
    %121 = arith.subf %117, %120 : vector<16x16xf32>
    %122 = math.exp %121 : vector<16x16xf32>
    %cst_39 = arith.constant dense<0.000000e+00> : vector<16xf32>
    %123 = vector.multi_reduction <add>, %122, %cst_39 [1] : vector<16x16xf32> to vector<16xf32>
    %124 = vector.shape_cast %123 : vector<16xf32> to vector<16x1xf32>
    %125 = tpu.reciprocal %124 {approx = true} : vector<16x1xf32> -> vector<16x1xf32>
    %126 = vector.broadcast %125 : vector<16x1xf32> to vector<16x16xf32>
    %127 = arith.mulf %122, %126 : vector<16x16xf32>
    %128 = arith.truncf %127 : vector<16x16xf32> to vector<16x16xbf16>
    %cst_40 = arith.constant dense<0.000000e+00> : vector<16x8xf32>
    %129 = tpu.matmul %128, %116, %cst_40 {dimension_numbers = #tpu.dot_dimension_numbers<[1], [0], [0], [1], [0, 0, 1, 1], [], []>} : vector<16x16xbf16>, vector<16x8xbf16>, vector<16x8xf32> -> vector<16x8xf32>
    %130 = arith.truncf %129 : vector<16x8xf32> to vector<16x8xbf16>
    %c24 = arith.constant 24 : index
    %c0_41 = arith.constant 0 : index
    %131 = vector.load %arg5[%c24, %c0_41] : memref<32x32xbf16, #tpu.memory_space<vmem>>, vector<8x32xbf16>
    %cst_42 = arith.constant dense<0.000000e+00> : vector<16x32xf32>
    %132 = tpu.matmul %130, %131, %cst_42 {dimension_numbers = #tpu.dot_dimension_numbers<[1], [0], [0], [1], [0, 0, 1, 1], [], []>} : vector<16x8xbf16>, vector<8x32xbf16>, vector<16x32xf32> -> vector<16x32xf32>
    %133 = arith.addf %108, %132 : vector<16x32xf32>
    %c0_43 = arith.constant 0 : index
    %c0_44 = arith.constant 0 : index
    %134 = vector.load %arg6[%c0_43, %c0_44] : memref<1x32xf32, #tpu.memory_space<vmem>>, vector<1x32xf32>
    %135 = vector.shape_cast %134 : vector<1x32xf32> to vector<32xf32>
    %136 = vector.shape_cast %135 : vector<32xf32> to vector<1x32xf32>
    %137 = vector.broadcast %136 : vector<1x32xf32> to vector<16x32xf32>
    %138 = arith.addf %133, %137 : vector<16x32xf32>
    %cst_45 = arith.constant 1.000000e+00 : f32
    %139 = vector.broadcast %cst_45 : f32 to vector<16x32xf32>
    %140 = arith.mulf %138, %139 : vector<16x32xf32>
    %141 = arith.addf %1, %140 : vector<16x32xf32>
    %c0_46 = arith.constant 0 : index
    %c0_47 = arith.constant 0 : index
    %c0_48 = arith.constant 0 : index
    %142 = vector.load %arg7[%c0_46, %c0_47, %c0_48] : memref<1x16x32xf32, #tpu.memory_space<vmem>>, vector<1x16x32xf32>
    %143 = vector.shape_cast %142 : vector<1x16x32xf32> to vector<16x32xf32>
    %144 = vector.shape_cast %141 : vector<16x32xf32> to vector<1x16x32xf32>
    tpu.vector_store %arg7[%c0_46, %c0_47, %c0_48], %144 {strides = array<i32>} : memref<1x16x32xf32, #tpu.memory_space<vmem>>, vector<1x16x32xf32>,
    return
  }
  func.func @transform_0(%arg0: i32) -> (i32, i32, i32) {
    %c0_i32 = arith.constant 0 : i32
    %c0_i32_0 = arith.constant 0 : i32
    %c0_i32_1 = arith.constant 0 : i32
    return %arg0, %c0_i32, %c0_i32_0 : i32, i32, i32
  }
  func.func @transform_1(%arg0: i32) -> (i32, i32) {
    %c0_i32 = arith.constant 0 : i32
    %c0_i32_0 = arith.constant 0 : i32
    %c0_i32_1 = arith.constant 0 : i32
    return %c0_i32, %c0_i32_0 : i32, i32
  }
  func.func @transform_2(%arg0: i32) -> (i32, i32) {
    %c0_i32 = arith.constant 0 : i32
    %c0_i32_0 = arith.constant 0 : i32
    %c0_i32_1 = arith.constant 0 : i32
    return %c0_i32, %c0_i32_0 : i32, i32
  }
  func.func @transform_3(%arg0: i32) -> (i32, i32) {
    %c0_i32 = arith.constant 0 : i32
    %c0_i32_0 = arith.constant 0 : i32
    %c0_i32_1 = arith.constant 0 : i32
    return %c0_i32, %c0_i32_0 : i32, i32
  }
  func.func @transform_4(%arg0: i32) -> (i32, i32) {
    %c0_i32 = arith.constant 0 : i32
    %c0_i32_0 = arith.constant 0 : i32
    %c0_i32_1 = arith.constant 0 : i32
    return %c0_i32, %c0_i32_0 : i32, i32
  }
  func.func @transform_5(%arg0: i32) -> (i32, i32) {
    %c0_i32 = arith.constant 0 : i32
    %c0_i32_0 = arith.constant 0 : i32
    %c0_i32_1 = arith.constant 0 : i32
    return %c0_i32, %c0_i32_0 : i32, i32
  }
  func.func @transform_6(%arg0: i32) -> (i32, i32, i32) {
    %c0_i32 = arith.constant 0 : i32
    %c0_i32_0 = arith.constant 0 : i32
    %c0_i32_1 = arith.constant 0 : i32
    return %arg0, %c0_i32, %c0_i32_0 : i32, i32, i32
  }
}

</mosaic_0001>

<bundles_post_ra>
// kernel: tpu_custom_call.1
= control target key start
LH: loop header
LB: loop body
LE: loop exit
PB: predicated region body
PF: predicated region fallthrough
CT: control target
= control target key end

     0   :  { %11 = vsyncpa [#allocation3], 0  ;;  %s1592_s0 = inlined_call_operand.hbm [shape: f32[2,16,32], index: 0, kind: input, shape index: {}]   ;;  %s1593_s1 = inlined_call_operand.hbm [shape: f32[1,32], index: 1, kind: input, shape index: {}]   ;;  %s1594_s2 = inlined_call_operand.vmem [shape: f32[1,32], index: 2, kind: input, shape index: {}]   ;;  %s1595_s3 = inlined_call_operand.hbm [shape: bf16[32,96], index: 3, kind: input, shape index: {}]   ;;  %s1596_s4 = inlined_call_operand.hbm [shape: bf16[32,32], index: 4, kind: input, shape index: {}]   ;;  %s1597_s5 = inlined_call_operand.vmem [shape: f32[1,32], index: 5, kind: input, shape index: {}]   ;;  %s1598_s6 = inlined_call_operand.hbm [shape: f32[2,16,32], index: 6, kind: output, shape index: {}]  }
   0x1   :  { %13 = vsyncpa [#allocation3 + $0x1], 0 }
   0x2   :  { %14 = vsyncpa [#allocation6], 0 }
   0x3   :  { %15 = vsyncpa [#allocation9], 0 }
   0x4   :  { %16 = vsyncpa [#allocation4], 0 }
   0x5   :  { %18 = vsyncpa [#allocation4 + $0x1], 0  ;;  %s1349_s21 = smov 0   ;;  %s1351_s22 = smov 0  }
   0x6   :  { %s1353_s23 = smov 0   ;;  %s1355_s24 = smov 0  }
   0x7 LB: > { %s1370_s25 = sadd.s32 4294967295, %s1291_s24   ;;  %s916_s26 = sadd.s32 4294967294, %s1291_s24   ;;  %s1291_s24 = sphi %s1355_s24, %s1609_s24   ;;  %s1287_s23 = sphi %s1353_s23, %s1608_s23   ;;  %s1283_s22 = sphi %s1351_s22, %s1607_s22   ;;  %s1279_s21 = sphi %s1349_s21, %s1606_s21  }
   0x8   : > { %p44_p0 = scmp.ne.s32.totalorder %s1283_s22, %s1279_s21  ;;  %p45_p1 = scmp.eq.s32.totalorder %s1370_s25, 0 }
   0x9   : > { %p173_p2 = scmp.eq.s32.totalorder %s1370_s25, 1  ;;  %p179_p3 = scmp.eq.s32.totalorder %s916_s26, 1 }
   0xa   : > { %p1379_p4 = por %p45_p1, %p44_p0  ;;  %p917_p5 = scmp.ge.s32.totalorder %s1291_s24, 1 }
   0xb   : > { %p1384_p6 = por %p179_p3, %p44_p0  ;;  %p186_p7 = scmp.lt.s32.totalorder %s1291_s24, 3 }
   0xc   : > { %s198_s7 = sshll.u32 %s1593_s1, 4  ;;  %s1293_s9 = smov [#allocation5]   ;;  %s199_s7 = int_to_ptr.hbm [resolvable:$true] %s198_s7 }
   0xd   : > { %p1392_p8 = pnand %p917_p5, %p186_p7  ;;  %s200_s10 = sshll.u32 %s1293_s9, 4  ;;  %s201_s10 = int_to_ptr.vmem [resolvable:$true] %s200_s10 }
   0xe   : > { %s212_s13 = sshll.u32 %s1595_s3, 4  ;;  %s1294_s15 = smov [#allocation7]   ;;  %s213_s13 = int_to_ptr.hbm [resolvable:$true] %s212_s13 }
   0xf   : > { %p977_p10 = pneg %p1392_p8  ;;  %s214_s16 = sshll.u32 %s1294_s15, 4  ;;  %s215_s16 = int_to_ptr.vmem [resolvable:$true] %s214_s16 }
  0x10   : > { %s1295_s17 = smov 64   ;;  %s1296_s18 = smov 4  }
  0x11   : > { %p1404_p11 = pnand %p977_p10, %p45_p1  ;;  %s226_s26 = sshll.u32 %s1596_s4, 4  ;;  %s227_s26 = int_to_ptr.hbm [resolvable:$true] %s226_s26 }
  0x12   : > { %s1297_s29 = smov [#allocation8]   ;;  %p38_p13 = scmp.ne.s32.totalorder %s1287_s23, %s1283_s22 }
  0x13   : > { %980 = dma.hbm_to_vmem [thread:$0]  (!%p1404_p11), %s199_s7, 16, %s201_s10, [#allocation6]  }
  0x14   : > { %983 = dma.hbm_to_vmem [thread:$0]  (!%p1404_p11), %s213_s13, 256, %s215_s16, [#allocation6], %s1295_s17, %s1295_s17, %s1296_s18  }
  0x15   : > { %s228_s30 = sshll.u32 %s1297_s29, 4  ;;  %s1418_s7 = sadd.s32 1, %s1291_s24   ;;  %s229_s30 = int_to_ptr.vmem [resolvable:$true] %s228_s30 }
  0x16   : > { %986 = dma.hbm_to_vmem [thread:$0]  (!%p1404_p11), %s227_s26, 256, %s229_s30, [#allocation9], %s1295_s17, %s1295_s17, %s1296_s18  }
  0x17   : > { %s28_s9 = ssub.s32 %s1291_s24, %s1418_s7  ;;  %s31_s10 = sadd.s32 1, %s1287_s23 }
  0x18   : > { %p29_p12 = scmp.eq.s32.totalorder %s28_s9, 0  ;;  %p39_p0 = scmp.eq.s32.totalorder %s1291_s24, 0 }
  0x19   : > { %p998_p3 = scmp.lt.s32.totalorder %s1291_s24, 2  ;;  %p1432_p7 = por %p173_p2, %p38_p13 }
  0x1a   : > { %s1428_s11 = scalar_select %p29_p12, %s1287_s23, %s31_s10  }
  0x1b   : > { %p40_p5 = por %p39_p0, %p38_p13  ;;  %s245_s13 = sand.u32 1, %s1287_s23  }
  0x1c   : > { %s957_s14 = sshll.u32 %s1291_s24, 4  ;;  %s922_s15 = sshll.u32 %s245_s13, 4 }
  0x1d   : > { %s254_s18 = scalar_lea.hbm %s1592_s0, %s957_s14  ;;  %s249_s20 = scalar_lea.vmem [#allocation2], %s922_s15 }
  0x1e   : > { %s255_s19 = sshll.u32 %s254_s18, 4  ;;  %s257_s26 = sshll.u32 %s249_s20, 4  ;;  %s256_s19 = int_to_ptr.hbm [resolvable:$true] %s255_s19  ;;  %s258_s26 = int_to_ptr.vmem [resolvable:$true] %s257_s26 }
  0x1f   : > { %p1443_p10 = pnand %p998_p3, %p40_p5  ;;  %s246_s30 = scalar_lea.sflag [#allocation3], %s245_s13 }
  0x20   : > { %s1187_s9 = sshra.s32 %s256_s19, 4  ;;  %s1194_s16 = scalar_lea.hbm %s1592_s0, 32  ;;  %s1188_s9 = int_to_ptr.hbm [resolvable:$true] %s1187_s9 }
  0x21   : > { %s1189_s10 = scalar_lea.hbm %s1188_s9, 16  ;;  %p1191_p11 = pneg %p1443_p10 }
  0x22   : > { %p1190_p2 = scmp.ne.s32.totalorder %s1188_s9, %s1189_s10  ;;  %p1195_p0 = scmp.lt.s32.totalorder %s1188_s9, %s1592_s0 }
  0x23   : > { %p1196_p3 = scmp.lt.s32.totalorder %s1194_s16, %s1189_s10 }
  0x24   : > { %p1192_p12 = pnand %p1191_p11, %p1190_p2 }
  0x25   : > { %p1197_p5 = por %p1196_p3, %p1195_p0 }
  0x26   : > { %p1193_p13 = pneg %p1192_p12 }
  0x28   : > { %p1198_p9 = pnand %p1197_p5, %p1193_p13 }
  0x2a   : > { %1201 = shalt.err (!%p1198_p9)
}
  0x2b   : > { %s1298_s13 = smov 128   ;;  %s1299_s20 = smov 8  }
  0x2c   : > { %990 = dma.hbm_to_vmem [thread:$0]  (!%p1443_p10), %s256_s19, 256, %s258_s26, %s246_s30, %s1298_s13, %s1298_s13, %s1299_s20  }
  0x2d   : > { %269 = sbr.rel (%p1392_p8) target bundleno = 1822 (0x71e), region = 44  ;;  %s1460_s14 = sand.u32 (!%p1392_p8), 1, %s1283_s22  }
  0x2e   : > { %s926_s9 = sshll.u32 (!%p1392_p8), %s1460_s14, 4  ;;  %s272_s10 = scalar_lea.sflag (!%p1392_p8), [#allocation3], %s1460_s14 }
  0x2f   : > { %s275_s15 = scalar_lea.vmem (!%p1392_p8), [#allocation2], %s926_s9 }
  0x32   : > { %1262 = dma.done.wait (%p1379_p4), %s272_s10, 256  }
  0x33   : > { %1264 = vsyncadd (%p1379_p4), %s272_s10, 4294967040 }
  0x34   : > { %1266 = dma.done.wait (%p45_p1), [#allocation6], 272  }
  0x35   : > { %1268 = vsyncadd (%p45_p1), [#allocation6], 4294967024 }
  0x36   : > { %1270 = dma.done.wait (%p45_p1), [#allocation9], 256  }
  0x37   : > { %1272 = vsyncadd (%p45_p1), [#allocation9], 4294967040  ;;  %vm325_vm0 = vcmask 261120   ;;  %v1478_v0 = vld [vmem:[%s275_s15] sm:$0xff]  ;;  %v1482_v2 = vld [vmem:[%s275_s15 + $0x8] sm:$0xff]  ;;  %v1300_v4 = vmov 32.0  }
  0x38   : > { %v326_v1 = vsel %vm325_vm0, %v1478_v0, 0.0  ;;  %v329_v3 = vsel %vm325_vm0, %v1482_v2, 0.0  ;;  %1059 = vrcp.f32 %v1300_v4  ;;  %v959_v21 = vld [vmem:[#allocation7 + $0x8] sm:$0xff]  ;;  %v958_v23 = vld [vmem:[#allocation7] sm:$0xff]  ;;  %v1056_v42 = vld [vmem:[#allocation5] ss:$0 sm:$0xff] }
  0x39   : > { %327 = vadd.xlane.f32.xlu0 %v326_v1  ;;  %413 = vmatpush.bf16.msra.mxu0 %v959_v21  ;;  %v1057_v47 = vld [vmem:[%s1594_s2] ss:$0 sm:$0xff]  ;;  %s1301_s19 = smov 96   ;;  %vm428_vm8 = vcmask 64512   ;;  %vm449_vm9 = vcmask 130048   ;;  %s1302_s26 = smov 80  }
  0x3a   : > { %s1303_s29 = smov 64   ;;  %s1304_s30 = smov 88   ;;  %vm568_vm10 = vcmask 1043456  }
  0x3b   : > { %s1305_s16 = smov 120   ;;  %s1306_s17 = smov 72  }
  0x3c   : > { %s1307_s18 = smov 112   ;;  %s1308_s13 = smov 104  }
  0x3d   : > { %414 = vmatpush.bf16.msra.mxu0 %v958_v23  ;;  %s1309_s20 = smov 56   ;;  %s1310_s10 = smov 40  }
  0x3e   : > { %v1060_v5 = vpop.eup %1059  ;;  %s1311_s15 = smov 48  }
  0x3f   : > { %v333_v6 = vmul.f32 32.0, %v1060_v5  ;;  %vm337_vm1 = vweird.f32 %v1060_v5 }
  0x41   : > { %330 = vadd.xlane.f32.xlu0 %v329_v3  ;;  %v334_v7 = vsub.f32 1.0, %v333_v6 }
  0x43   : > { %v335_v8 = vmul.f32 %v1060_v5, %v334_v7 }
  0x45   : > { %v336_v9 = vadd.f32 %v1060_v5, %v335_v8 }
  0x47   : > { %v338_v10 = vsel %vm337_vm1, %v1060_v5, %v336_v9 }
  0xac   : > { %v328_v11 = vpop.xlane.xlu0 %327 }
  0xad   : > { %v339_v12 = vmul.f32 %v338_v10, %v328_v11 }
  0xaf   : > { %v341_v13 = vsub.f32 %v1478_v0, %v339_v12  ;;  %v494_v12 = vld [vmem:[#allocation8] sm:$0xf] }
  0xb1   : > { %v343_v14 = vmul.f32 %v341_v13, %v341_v13 }
  0xb3   : > { %v345_v15 = vsel %vm325_vm0, %v343_v14, 0.0 }
  0xb4   : > { %346 = vadd.xlane.f32.xlu1 %v345_v15  ;;  %v331_v16 = vpop.xlane.xlu0 %330 }
  0xb5   : > { %v340_v17 = vmul.f32 %v338_v10, %v331_v16 }
  0xb7   : > { %v342_v18 = vsub.f32 %v1482_v2, %v340_v17 }
  0xb9   : > { %v344_v19 = vmul.f32 %v342_v18, %v342_v18 }
  0xbb   : > { %v348_v20 = vsel %vm325_vm0, %v344_v19, 0.0 }
  0xbc   : > { %349 = vadd.xlane.f32.xlu1 %v348_v20 }
 0x127   : > { %v347_v22 = vpop.xlane.xlu1 %346 }
 0x128   : > { %v351_v24 = vmul.f32 %v347_v22, %v338_v10 }
 0x12a   : > { %v353_v25 = vadd.f32 1e-05, %v351_v24 }
 0x12c   : > { %1061 = vrsqrt.f32 %v353_v25  ;;  %vm361_vm3 = vweird.f32 %v353_v25 }
 0x12f   : > { %v350_v26 = vpop.xlane.xlu1 %349 }
 0x130   : > { %v352_v27 = vmul.f32 %v350_v26, %v338_v10 }
 0x132   : > { %v1062_v28 = vpop.eup %1061  ;;  %v354_v29 = vadd.f32 1e-05, %v352_v27 }
 0x133   : > { %v356_v30 = vmul.f32 %v1062_v28, %v353_v25  ;;  %vm362_vm2 = vweird.f32 %v1062_v28 }
 0x134   : > { %1063 = vrsqrt.f32 %v354_v29  ;;  %vm363_vm4 = vmor %vm361_vm3, %vm362_vm2  ;;  %vm371_vm6 = vweird.f32 %v354_v29 }
 0x135   : > { %v357_v31 = vmul.f32 %v1062_v28, %v356_v30 }
 0x137   : > { %v358_v32 = vmul.f32 0.5, %v357_v31 }
 0x139   : > { %v359_v33 = vsub.f32 1.5, %v358_v32 }
 0x13a   : > { %v1064_v34 = vpop.eup %1063 }
 0x13b   : > { %v360_v35 = vmul.f32 %v1062_v28, %v359_v33  ;;  %v366_v36 = vmul.f32 %v1064_v34, %v354_v29  ;;  %vm372_vm5 = vweird.f32 %v1064_v34 }
 0x13c   : > { %vm373_vm7 = vmor %vm371_vm6, %vm372_vm5 }
 0x13d   : > { %v367_v37 = vmul.f32 %v1064_v34, %v366_v36  ;;  %v364_v38 = vsel %vm363_vm4, %v1062_v28, %v360_v35 }
 0x13e   : > { %v375_v41 = vmul.f32 %v364_v38, %v341_v13  ;;  %v590_v13 = vsel %vm568_vm10, %v494_v12, 0 }
 0x13f   : > { %v368_v39 = vmul.f32 0.5, %v367_v37 }
 0x140   : > { %v380_v46 = vmul.f32 %v1056_v42, %v375_v41 }
 0x141   : > { %v369_v40 = vsub.f32 1.5, %v368_v39 }
 0x142   : > { %v385_v49 = vadd.f32 %v1057_v47, %v380_v46 }
 0x143   : > { %v370_v43 = vmul.f32 %v1064_v34, %v369_v40 }
 0x145   : > { %v374_v44 = vsel %vm373_vm7, %v1064_v34, %v370_v43 }
 0x146   : > { %v376_v45 = vmul.f32 %v374_v44, %v342_v18 }
 0x148   : > { %v381_v48 = vmul.f32 %v1056_v42, %v376_v45 }
 0x14a   : > { %v386_v50 = vadd.f32 %v1057_v47, %v381_v48 }
 0x14c   : > { %v387_v51 = vpack.c.bf16 %v386_v50, %v385_v49 }
 0x14e   : > { %939 = vmatmul.msk.bf16.vlgmr.msra.gmra.mxu0 %vm325_vm0, %v387_v51 }
 0x1cb   : > { %v416_v52 = vpop.f32.mrf.mxu0 }
 0x1cc   : > { %v421_v58 = vmul.f32 0.35355338, %v416_v52 }
 0x1d3   : > { %v418_v53 = vpop.f32.mrf.mxu0 }
 0x1d4   : > { %v1494_v54 = vpack.c.bf16 %v418_v53, %v416_v52  ;;  %v422_v57 = vmul.f32 0.35355338, %v418_v53 }
 0x1d6   : > { %426 = vrot.lane.b32.xlu2 %v1494_v54, %s1301_s19  ;;  %v423_v59 = vpack.c.bf16 %v422_v57, %v421_v58  ;;  %s960_s19 = sshll.u32 %s1370_s25, 4 }
 0x230   : > { %v427_v55 = vpop.permute.xlu2 %426 }
 0x231   : > { %v433_v56 = vsel %vm428_vm8, %v427_v55, 0 }
 0x232   : > { %442 = vmatpush.bf16.xpose.msra.mxu1 %v433_v56 }
 0x239   : > { %940 = vmatmul.msk.bf16.vlgmr.msra.gmra.mxu1 %vm428_vm8, %v423_v59 }
 0x23a   : > { %599 = vmatpush.bf16.msrb.mxu1 %v590_v13 }
 0x2b6   : > { %v444_v60 = vpop.f32.mrf.mxu1 }
 0x2b7   : > { %v450_v61 = vsel %vm449_vm9, %v444_v60, -inf }
 0x2b8   : > { %451 = vmax.xlane.f32.xlu2 %v450_v61 }
 0x2be   : > { %v446_v62 = vpop.f32.mrf.mxu1 }
 0x2bf   : > { %v453_v63 = vsel %vm449_vm9, %v446_v62, -inf }
 0x2c0   : > { %454 = vmax.xlane.f32.xlu0 %v453_v63 }
 0x2d0   : > { %608 = vrot.lane.b32.xlu2 %v1494_v54, %s1302_s26 }
 0x32b   : > { %v452_v1 = vpop.xlane.xlu2 %451 }
 0x32c   : > { %v456_v3 = vsub.f32 %v444_v60, %v452_v1 }
 0x32e   : > { %v458_v4 = vmul.f32 1.442695, %v456_v3 }
 0x330   : > { %1065 = vpow2.f32 %v458_v4 }
 0x333   : > { %v455_v5 = vpop.xlane.xlu0 %454  ;;  %v609_v21 = vpop.permute.xlu2 %608 }
 0x334   : > { %v457_v6 = vsub.f32 %v446_v62, %v455_v5  ;;  %v614_v25 = vsel %vm428_vm8, %v609_v21, 0 }
 0x336   : > { %v1066_v7 = vpop.eup %1065  ;;  %v460_v8 = vmul.f32 1.442695, %v457_v6 }
 0x337   : > { %v462_v9 = vsel %vm449_vm9, %v1066_v7, 0.0 }
 0x338   : > { %1067 = vpow2.f32 %v460_v8  ;;  %463 = vadd.xlane.f32.xlu1 %v462_v9 }
 0x33e   : > { %v1068_v10 = vpop.eup %1067 }
 0x33f   : > { %v465_v11 = vsel %vm449_vm9, %v1068_v10, 0.0 }
 0x340   : > { %466 = vadd.xlane.f32.xlu0 %v465_v11 }
 0x351   : > { %473 = vrot.lane.b32.xlu1 %v1494_v54, %s1303_s29 }
 0x354   : > { %498 = vrot.lane.b32.xlu0 %v1494_v54, %s1304_s30  ;;  %s810_s30 = scalar_lea.hbm %s1598_s6, %s960_s19 }
 0x355   : > { %s813_s25 = sshll.u32 %s810_s30, 4  ;;  %s814_s25 = int_to_ptr.hbm [resolvable:$true] %s813_s25 }
 0x359   : > { %496 = vrot.lane.b32.xlu1 %v423_v59, %s1305_s16  ;;  %s319_s16 = scalar_lea.vmem [#allocation10], %s926_s9 }
 0x35c   : > { %699 = vrot.lane.b32.xlu0 %v1494_v54, %s1306_s17  ;;  %s811_s17 = sshll.u32 %s319_s16, 4  ;;  %s812_s17 = int_to_ptr.vmem [resolvable:$true] %s811_s17 }
 0x361   : > { %606 = vrot.lane.b32.xlu1 %v423_v59, %s1307_s18  ;;  %s799_s18 = scalar_lea.sflag [#allocation4], %s1460_s14 }
 0x364   : > { %697 = vrot.lane.b32.xlu0 %v423_v59, %s1308_s13  ;;  %s1231_s13 = sshra.s32 %s814_s25, 4  ;;  %s1232_s13 = int_to_ptr.hbm [resolvable:$true] %s1231_s13 }
 0x365   : > { %p1238_p9 = scmp.lt.s32.totalorder %s1232_s13, %s1598_s6 }
 0x3ab   : > { %v464_v15 = vpop.xlane.xlu1 %463 }
 0x3b3   : > { %v467_v14 = vpop.xlane.xlu0 %466 }
 0x3b4   : > { %1069 = vrcp.f32 %v467_v14 }
 0x3b5   : > { %1071 = vrcp.f32 %v464_v15 }
 0x3ba   : > { %v1070_v16 = vpop.eup %1069 }
 0x3bb   : > { %v1072_v17 = vpop.eup %1071  ;;  %v471_v18 = vmul.f32 %v1070_v16, %v1068_v10 }
 0x3bc   : > { %v470_v20 = vmul.f32 %v1072_v17, %v1066_v7 }
 0x3be   : > { %v472_v22 = vpack.c.bf16 %v471_v18, %v470_v20 }
 0x3c3   : > { %v474_v19 = vpop.permute.xlu1 %473 }
 0x3c4   : > { %486 = vmatpush.bf16.msra.mxu2 %v474_v19 }
 0x3c6   : > { %v499_v23 = vpop.permute.xlu0 %498 }
 0x3c7   : > { %941 = vmatmul.msk.bf16.vlgmr.msra.gmra.mxu2 %vm449_vm9, %v472_v22  ;;  %v504_v24 = vsel %vm428_vm8, %v499_v23, 0 }
 0x3c8   : > { %513 = vmatpush.bf16.xpose.msra.mxu3 %v504_v24 }
 0x3cb   : > { %v497_v26 = vpop.permute.xlu1 %496 }
 0x3ce   : > { %v700_v27 = vpop.permute.xlu0 %699 }
 0x3cf   : > { %v705_v28 = vsel %vm428_vm8, %v700_v27, 0  ;;  %942 = vmatmul.msk.bf16.vlgmr.msra.gmra.mxu3 %vm428_vm8, %v497_v26  ;;  %v564_v26 = vld [vmem:[#allocation8 + $0x4] sm:$0xf] }
 0x3d0   : > { %623 = vmatpush.bf16.xpose.msrb.mxu3 %v614_v25  ;;  %714 = vmatpush.bf16.xpose.msra.mxu1 %v705_v28  ;;  %v570_v27 = vsel %vm568_vm10, %v564_v26, 0 }
 0x3d1   : > { %579 = vmatpush.bf16.msrb.mxu0 %v570_v27 }
 0x3d3   : > { %v607_v29 = vpop.permute.xlu1 %606 }
 0x3d6   : > { %v698_v39 = vpop.permute.xlu0 %697 }
 0x3df   : > { %946 = vmatmul.msk.bf16.vlgmr.msrb.gmra.mxu3 %vm428_vm8, %v607_v29 }
 0x44a   : > { %v488_v30 = vpop.f32.mrf.mxu2 }
 0x452   : > { %v490_v31 = vpop.f32.mrf.mxu2  ;;  %v515_v32 = vpop.f32.mrf.mxu3 }
 0x453   : > { %v493_v33 = vpack.c.bf16 %v490_v31, %v488_v30  ;;  %v520_v34 = vsel %vm449_vm9, %v515_v32, -inf }
 0x454   : > { %521 = vmax.xlane.f32.xlu1 %v520_v34 }
 0x455   : > { %945 = vmatmul.msk.bf16.vlgmr.msrb.gmra.mxu1 %vm428_vm8, %v493_v33 }
 0x45a   : > { %v517_v35 = vpop.f32.mrf.mxu3 }
 0x45b   : > { %v523_v36 = vsel %vm449_vm9, %v517_v35, -inf }
 0x45c   : > { %524 = vmax.xlane.f32.xlu0 %v523_v36 }
 0x462   : > { %v625_v37 = vpop.f32.mrf.mxu3 }
 0x463   : > { %v630_v38 = vsel %vm449_vm9, %v625_v37, -inf }
 0x464   : > { %631 = vmax.xlane.f32.xlu0 %v630_v38 }
 0x465   : > { %949 = vmatmul.msk.bf16.vlgmr.msra.gmra.mxu1 %vm428_vm8, %v698_v39 }
 0x46a   : > { %v627_v53 = vpop.f32.mrf.mxu3 }
 0x46b   : > { %v633_v57 = vsel %vm449_vm9, %v627_v53, -inf }
 0x4c7   : > { %v522_v47 = vpop.xlane.xlu1 %521 }
 0x4c8   : > { %v526_v48 = vsub.f32 %v515_v32, %v522_v47  ;;  %v765_v47 = vld [vmem:[#allocation8 + $0xc] sm:$0xf] }
 0x4ca   : > { %v528_v51 = vmul.f32 1.442695, %v526_v48  ;;  %v770_v48 = vsel %vm568_vm10, %v765_v47, 0 }
 0x4cf   : > { %v525_v40 = vpop.xlane.xlu0 %524 }
 0x4d0   : > { %v527_v41 = vsub.f32 %v517_v35, %v525_v40 }
 0x4d2   : > { %v530_v42 = vmul.f32 1.442695, %v527_v41  ;;  %v1519_v43 = vpop.f32.mrf.mxu1 }
 0x4d4   : > { %1073 = vpow2.f32 %v530_v42 }
 0x4d5   : > { %1075 = vpow2.f32 %v528_v51 }
 0x4d7   : > { %v632_v52 = vpop.xlane.xlu0 %631 }
 0x4d8   : > { %v636_v55 = vsub.f32 %v625_v37, %v632_v52 }
 0x4da   : > { %v1074_v44 = vpop.eup %1073  ;;  %v1521_v45 = vpop.f32.mrf.mxu1  ;;  %v638_v59 = vmul.f32 1.442695, %v636_v55 }
 0x4db   : > { %v535_v46 = vsel %vm449_vm9, %v1074_v44, 0.0  ;;  %v1076_v60 = vpop.eup %1075 }
 0x4dc   : > { %536 = vadd.xlane.f32.xlu0 %v535_v46  ;;  %1077 = vpow2.f32 %v638_v59  ;;  %v532_v61 = vsel %vm449_vm9, %v1076_v60, 0.0 }
 0x4e2   : > { %v716_v49 = vpop.f32.mrf.mxu1  ;;  %v1528_v62 = vpop.eup %1077 }
 0x4e3   : > { %v721_v50 = vsel %vm449_vm9, %v716_v49, -inf  ;;  %v642_v63 = vsel %vm449_vm9, %v1528_v62, 0.0 }
 0x4e4   : > { %722 = vmax.xlane.f32.xlu2 %v721_v50 }
 0x4ea   : > { %v718_v56 = vpop.f32.mrf.mxu1 }
 0x4eb   : > { %v724_v58 = vsel %vm449_vm9, %v718_v56, -inf }
 0x4ec   : > { %634 = vmax.xlane.f32.xlu2 %v633_v57  ;;  %725 = vmax.xlane.f32.xlu1 %v724_v58 }
 0x4f4   : > { %533 = vadd.xlane.f32.xlu1 %v532_v61 }
 0x4fc   : > { %643 = vadd.xlane.f32.xlu1 %v642_v63 }
 0x504   : > { %543 = vrot.lane.b32.xlu2 %v1494_v54, %s1309_s20  ;;  %s1233_s20 = scalar_lea.hbm %s1232_s13, 16 }
 0x505   : > { %p1234_p1 = scmp.ne.s32.totalorder %s1232_s13, %s1233_s20 }
 0x507   : > { %p1235_p4 = pnand %p1234_p1, %p1432_p7 }
 0x509   : > { %p1236_p8 = pneg %p1235_p4 }
 0x54f   : > { %v537_v11 = vpop.xlane.xlu0 %536 }
 0x557   : > { %v723_v1 = vpop.xlane.xlu2 %722 }
 0x558   : > { %v727_v3 = vsub.f32 %v716_v49, %v723_v1  ;;  %v674_v49 = vld [vmem:[#allocation8 + $0x8] sm:$0xf]  ;;  %v1058_v1 = vld [vmem:[%s1597_s5] ss:$0 sm:$0xff] }
 0x559   : > { %v679_v50 = vsel %vm568_vm10, %v674_v49, 0 }
 0x55a   : > { %v729_v4 = vmul.f32 1.442695, %v727_v3  ;;  %688 = vmatpush.bf16.msra.mxu0 %v679_v50 }
 0x55c   : > { %1079 = vpow2.f32 %v729_v4 }
 0x55f   : > { %v635_v5 = vpop.xlane.xlu2 %634  ;;  %v726_v6 = vpop.xlane.xlu1 %725 }
 0x560   : > { %v637_v7 = vsub.f32 %v627_v53, %v635_v5  ;;  %v728_v10 = vsub.f32 %v718_v56, %v726_v6 }
 0x562   : > { %v1080_v8 = vpop.eup %1079  ;;  %v640_v9 = vmul.f32 1.442695, %v637_v7  ;;  %v731_v13 = vmul.f32 1.442695, %v728_v10 }
 0x563   : > { %v733_v12 = vsel %vm449_vm9, %v1080_v8, 0.0 }
 0x564   : > { %1081 = vpow2.f32 %v640_v9  ;;  %734 = vadd.xlane.f32.xlu1 %v733_v12 }
 0x565   : > { %1083 = vrcp.f32 %v537_v11 }
 0x567   : > { %v544_v14 = vpop.permute.xlu2 %543  ;;  %v534_v15 = vpop.xlane.xlu1 %533 }
 0x568   : > { %1085 = vrcp.f32 %v534_v15  ;;  %556 = vmatpush.bf16.msrb.mxu2 %v544_v14 }
 0x569   : > { %1087 = vpow2.f32 %v731_v13 }
 0x56a   : > { %v1082_v16 = vpop.eup %1081 }
 0x56b   : > { %v645_v17 = vsel %vm449_vm9, %v1082_v16, 0.0  ;;  %v1084_v18 = vpop.eup %1083 }
 0x56c   : > { %646 = vadd.xlane.f32.xlu0 %v645_v17  ;;  %v541_v20 = vmul.f32 %v1084_v18, %v1074_v44 }
 0x56e   : > { %v1086_v19 = vpop.eup %1085 }
 0x56f   : > { %v540_v21 = vmul.f32 %v1086_v19, %v1076_v60  ;;  %v1088_v22 = vpop.eup %1087  ;;  %v644_v25 = vpop.xlane.xlu1 %643 }
 0x570   : > { %v736_v24 = vsel %vm449_vm9, %v1088_v22, 0.0 }
 0x571   : > { %v542_v23 = vpack.c.bf16 %v541_v20, %v540_v21 }
 0x573   : > { %943 = vmatmul.msk.bf16.vlgmr.msrb.gmra.mxu2 %vm449_vm9, %v542_v23 }
 0x574   : > { %737 = vadd.xlane.f32.xlu0 %v736_v24 }
 0x57d   : > { %744 = vrot.lane.b32.xlu1 %v1494_v54, %s1310_s10 }
 0x588   : > { %653 = vrot.lane.b32.xlu0 %v1494_v54, %s1311_s15  ;;  %s1237_s15 = scalar_lea.hbm %s1598_s6, 32 }
 0x589   : > { %p1239_p10 = scmp.lt.s32.totalorder %s1237_s15, %s1233_s20 }
 0x58b   : > { %p1240_p2 = por %p1239_p10, %p1238_p9 }
 0x58d   : > { %p1241_p11 = pnand %p1240_p2, %p1236_p8 }
 0x5d7   : > { %v735_v29 = vpop.xlane.xlu1 %734 }
 0x5d8   : > { %1089 = vrcp.f32 %v735_v29 }
 0x5de   : > { %v1090_v31 = vpop.eup %1089 }
 0x5df   : > { %v647_v28 = vpop.xlane.xlu0 %646  ;;  %v741_v33 = vmul.f32 %v1090_v31, %v1080_v8 }
 0x5e7   : > { %v738_v30 = vpop.xlane.xlu0 %737 }
 0x5e8   : > { %1091 = vrcp.f32 %v738_v30 }
 0x5e9   : > { %1093 = vrcp.f32 %v647_v28 }
 0x5ea   : > { %1095 = vrcp.f32 %v644_v25 }
 0x5ee   : > { %v1092_v32 = vpop.eup %1091 }
 0x5ef   : > { %v742_v34 = vmul.f32 %v1092_v32, %v1088_v22  ;;  %v745_v35 = vpop.permute.xlu1 %744  ;;  %v1094_v54 = vpop.eup %1093 }
 0x5f0   : > { %757 = vmatpush.bf16.msra.mxu3 %v745_v35  ;;  %v1096_v38 = vpop.eup %1095  ;;  %v651_v39 = vmul.f32 %v1094_v54, %v1082_v16 }
 0x5f1   : > { %v743_v36 = vpack.c.bf16 %v742_v34, %v741_v33  ;;  %v650_v40 = vmul.f32 %v1096_v38, %v1528_v62 }
 0x5f3   : > { %950 = vmatmul.msk.bf16.vlgmr.msra.gmra.mxu3 %vm449_vm9, %v743_v36  ;;  %v652_v42 = vpack.c.bf16 %v651_v39, %v650_v40 }
 0x5f6   : > { %v558_v37 = vpop.f32.mrf.mxu2 }
 0x5fa   : > { %v654_v41 = vpop.permute.xlu0 %653 }
 0x5fb   : > { %666 = vmatpush.bf16.msra.mxu2 %v654_v41 }
 0x5fe   : > { %v560_v44 = vpop.f32.mrf.mxu2  ;;  %947 = vmatmul.msk.bf16.vlgmr.msra.gmra.mxu2 %vm449_vm9, %v652_v42 }
 0x5ff   : > { %v563_v46 = vpack.c.bf16 %v560_v44, %v558_v37  ;;  %779 = vmatpush.bf16.msrb.mxu2 %v770_v48 }
 0x601   : > { %944 = vmatmul.msk.bf16.vlgmr.msrb.gmra.mxu0 %vm428_vm8, %v563_v46 }
 0x676   : > { %v759_v51 = vpop.f32.mrf.mxu3 }
 0x67e   : > { %v761_v52 = vpop.f32.mrf.mxu3  ;;  %v581_v58 = vpop.f32.mrf.mxu0 }
 0x67f   : > { %v764_v53 = vpack.c.bf16 %v761_v52, %v759_v51  ;;  %v602_v60 = vadd.f32 %v1519_v43, %v581_v58 }
 0x681   : > { %v668_v55 = vpop.f32.mrf.mxu2  ;;  %951 = vmatmul.msk.bf16.vlgmr.msrb.gmra.mxu2 %vm428_vm8, %v764_v53 }
 0x686   : > { %v583_v59 = vpop.f32.mrf.mxu0 }
 0x687   : > { %v604_v5 = vadd.f32 %v1521_v45, %v583_v59 }
 0x689   : > { %v670_v56 = vpop.f32.mrf.mxu2 }
 0x68a   : > { %v673_v57 = vpack.c.bf16 %v670_v56, %v668_v55 }
 0x68c   : > { %948 = vmatmul.msk.bf16.vlgmr.msra.gmra.mxu0 %vm428_vm8, %v673_v57 }
 0x704   : > { %v781_v61 = vpop.f32.mrf.mxu2 }
 0x709   : > { %v690_v62 = vpop.f32.mrf.mxu0 }
 0x70a   : > { %v695_v63 = vadd.f32 %v690_v62, %v602_v60 }
 0x70c   : > { %v786_v3 = vadd.f32 %v781_v61, %v695_v63  ;;  %v783_v8 = vpop.f32.mrf.mxu2 }
 0x70e   : > { %v792_v4 = vadd.f32 %v1058_v1, %v786_v3 }
 0x710   : > { %v794_v6 = vadd.f32 %v792_v4, %v1478_v0 }
 0x711   : > { %v692_v7 = vpop.f32.mrf.mxu0 }
 0x712   : > { %796 = vst.msk [vmem:[%s319_s16] sm:$0xff] %vm325_vm0, %v794_v6  ;;  %v696_v43 = vadd.f32 %v692_v7, %v604_v5 }
 0x714   : > { %v787_v9 = vadd.f32 %v783_v8, %v696_v43 }
 0x716   : > { %v793_v10 = vadd.f32 %v1058_v1, %v787_v9 }
 0x718   : > { %v795_v0 = vadd.f32 %v793_v10, %v1482_v2 }
 0x71a   : > { %797 = vst.msk [vmem:[%s319_s16 + $0x8] sm:$0xff] %vm325_vm0, %v795_v0 }
 0x71b   : > { %1244 = shalt.err (!%p1241_p11)
}
 0x71c   : > { %s1312_s14 = smov 128   ;;  %s1313_s19 = smov 8  }
 0x71d   : > { %975 = dma.vmem_to_hbm [thread:$0]  (%p1432_p7), %s812_s17, 256, %s814_s25, %s799_s18, %s1312_s14, %s1312_s14, %s1313_s19  }
 0x71e PF: > { %s828_s26 = sand.u32 1, %s1279_s21   ;;  %p1605_p12 = scmp.ge.s32.totalorder %s1291_s24, 2 }
 0x71f   : > { %s829_s29 = scalar_lea.sflag [#allocation4], %s828_s26 }
 0x720   : > { %p992_p13 = pnand %p1605_p12, %p1384_p6 }
 0x722   : > { %p993_p0 = pneg %p992_p13 }
 0x724   : > { %1274 = dma.done.wait (%p993_p0), %s829_s29, 256  }
 0x725   : > { %1276 = vsyncadd (%p993_p0), %s829_s29, 4294967040  ;;  %p21_p3 = scmp.ge.s32.totalorder %s1418_s7, 4   ;;  %s1606_s21 = smov %s1283_s22 }
 0x726   : > { %s1607_s22 = smov %s1287_s23  ;;  %s1608_s23 = smov %s1428_s11 }
 0x727   : > { %s1609_s24 = smov %s1418_s7  ;;  %23 = sbr.rel (!%p21_p3) target bundleno = 7 (0x7), region = 101 }
 0x72c   :  { %835 = vsyncpa [#allocation3], 1 }
 0x72d   :  { %837 = vsyncpa [#allocation3 + $0x1], 1 }
 0x72e   :  { %838 = vsyncpa [#allocation6], 1 }
 0x72f   :  { %839 = vsyncpa [#allocation9], 1 }
 0x730   :  { %840 = vsyncpa [#allocation4], 1 }
 0x731   :  { %842 = vsyncpa [#allocation4 + $0x1], 1 }

</bundles_post_ra>
